<compile_context>
chip_gen: v6e
topology: v6e:2x2x1
jax: 0.10.0
libtpu: 0.0.40
codegen_flags: <defaults>
</compile_context>

<pallas_src>
import functools

import jax
import jax.numpy as jnp
from jax.experimental import pallas as pl
from jax.experimental.pallas import tpu as pltpu


# ----------------------------------------------------------------------------
# Pallas kernel: lane-axis concatenation of the flattened token*feature dims.
#   a_ref: (TB, Na*D)   v_ref: (TB, Nv*D)   o_ref: (TB, (Na+Nv)*D)
# When a_width % 128 == 0 (true for the module's Na=8, D=32) both stores are
# unmasked, fully lane-dense vst; otherwise the seam store is masked but the
# result is still exact.
# ----------------------------------------------------------------------------
def _concat_lanes_kernel(a_ref, v_ref, o_ref, *, a_width):
    o_ref[:, :a_width] = a_ref[...]
    o_ref[:, a_width:] = v_ref[...]


def _packed_sublanes(itemsize):
    """Rows per vreg-sublane group for this dtype (8 f32, 16 bf16, 32 int8)."""
    return max(8, 8 * (4 // max(1, itemsize)))


def _vmem_budget_and_limit():
    """Generation-aware (budget, vmem_limit_bytes).

    ~96/100 MiB on 128 MiB parts (v5e/v6e); conservative 40/48 MiB otherwise
    (v7x per-TC VMEM is 64 MiB) or when the query is unavailable.
    """
    try:
        cap = pltpu.get_tpu_info().vmem_capacity_bytes
    except Exception:  # non-TPU backend / interpret mode / older jax
        cap = 64 << 20
    if cap >= (128 << 20):
        return 96 << 20, 100 << 20
    return 40 << 20, 48 << 20


def _pick_row_tile(rows, out_row_bytes, vmem_budget_bytes, sublane):
    """Choose how many (b*s) rows to process per grid step.

    Double-buffered audio+vision inputs plus the double-buffered output tile
    cost roughly 2 * (a + v + out) * TB ~= 4 * out_row_bytes * TB bytes.
    """
    # Largest TB that fits the VMEM budget.
    max_tb = max(1, vmem_budget_bytes // (4 * out_row_bytes))
    tb = min(max_tb, rows)

    # Give the BlockSpec pipeline something to overlap: target >= 8 grid steps
    # (an even count, so both v7x TensorCores split the "parallel" axis) but
    # never shrink a step below ~1 MiB of output payload.
    target_steps = 8
    min_step_rows = max(1, (1 << 20) // out_row_bytes)   # ~1 MiB per step
    tb_for_steps = -(-rows // target_steps)              # cdiv(rows, 8)
    tb = min(tb, max(tb_for_steps, min_step_rows))

    # Sublane-align the block-row count when possible; small inputs use the
    # full extent (always a legal block shape).
    if rows >= sublane and tb >= sublane:
        tb = (tb // sublane) * sublane
    else:
        tb = rows
    return max(1, min(tb, rows))


def pairwise_cross_attention_forward(
    audio_feature, vision_feature, params=None, *, small_fallback_bytes=256 << 10
):
    """Mirrors PairwiseCrossAttention.forward exactly.

    audio_feature : (B, S, Na, D)
    vision_feature: (B, S, Nv, D)
    returns       : (B, S, Na+Nv, D)
    """
    del params  # unused by the reference forward pass
    B, Sa, Na, Da = audio_feature.shape
    Bv, Sv, Nv, Dv = vision_feature.shape
    assert B == Bv and Sa == Sv and Da == Dv, "reference forward requires these to match"

    rows = B * Sa
    a_width = Na * Da
    v_width = Nv * Dv
    o_width = a_width + v_width
    itemsize = jnp.dtype(audio_feature.dtype).itemsize
    out_bytes = rows * o_width * itemsize

    # Free (contiguous) reshapes: flatten tokens into the lane axis.
    a2 = audio_feature.reshape(rows, a_width)
    v2 = vision_feature.reshape(rows, v_width)

    # Tiny-input fallback: below a few hundred KiB the custom-call + grid-step
    # overhead dominates and XLA's fused concatenate is strictly faster.
    if out_bytes < small_fallback_bytes:
        out = jnp.concatenate([a2, v2], axis=1)
        return out.reshape(B, Sa, Na + Nv, Da)

    vmem_budget, vmem_limit = _vmem_budget_and_limit()
    sublane = _packed_sublanes(itemsize)
    TB = _pick_row_tile(rows, o_width * itemsize, vmem_budget, sublane)

    # Very-wide-row guard: if even this minimal tile would exceed the VMEM
    # limit, don't risk a compile-time VMEM OOM (most likely on v7x's 64 MiB).
    # TODO(synk): split the lane dimension into a second grid axis for rows
    # wider than ~vmem_limit/32 instead of falling back to XLA.
    if 4 * TB * o_width * itemsize > vmem_limit:
        out = jnp.concatenate([a2, v2], axis=1)
        return out.reshape(B, Sa, Na + Nv, Da)

    kernel = functools.partial(_concat_lanes_kernel, a_width=a_width)

    out = pl.pallas_call(
        kernel,
        grid=(pl.cdiv(rows, TB),),
        in_specs=[
            pl.BlockSpec((TB, a_width), lambda i: (i, 0)),
            pl.BlockSpec((TB, v_width), lambda i: (i, 0)),
        ],
        out_specs=pl.BlockSpec((TB, o_width), lambda i: (i, 0)),
        out_shape=jax.ShapeDtypeStruct((rows, o_width), audio_feature.dtype),
        compiler_params=pltpu.CompilerParams(
            dimension_semantics=("parallel",),
            vmem_limit_bytes=vmem_limit,
        ),
        cost_estimate=pl.CostEstimate(
            flops=0, transcendentals=0, bytes_accessed=2 * out_bytes
        ),
    )(a2, v2)

    return out.reshape(B, Sa, Na + Nv, Da)


# ----------------------------------------------------------------------------
# Deterministic parameter init (shapes from __init__; unused in forward()).
# ----------------------------------------------------------------------------
def init_params(key, hidden_size):
    ks = jax.random.split(key, 4)
    h = hidden_size
    return {
        # nn.MultiheadAttention(hidden_size, 8)
        "cma_in_proj_weight": jax.random.normal(ks[0], (3 * h, h), jnp.float32) * 0.02,
        "cma_in_proj_bias": jnp.zeros((3 * h,), jnp.float32),
        "cma_out_proj_weight": jax.random.normal(ks[1], (h, h), jnp.float32) * 0.02,
        "cma_out_proj_bias": jnp.zeros((h,), jnp.float32),
        # nn.LayerNorm(hidden_size) x2
        "ln1_weight": jnp.ones((h,), jnp.float32),
        "ln1_bias": jnp.zeros((h,), jnp.float32),
        "ln2_weight": jnp.ones((h,), jnp.float32),
        "ln2_bias": jnp.zeros((h,), jnp.float32),
        # FFN: Linear(h, 4h) -> ReLU -> Linear(4h, h)
        "ffn_w1": jax.random.normal(ks[2], (4 * h, h), jnp.float32) * 0.02,
        "ffn_b1": jnp.zeros((4 * h,), jnp.float32),
        "ffn_w2": jax.random.normal(ks[3], (h, 4 * h), jnp.float32) * 0.02,
        "ffn_b2": jnp.zeros((h,), jnp.float32),
    }


if __name__ == "__main__":
    key = jax.random.PRNGKey(0)
    k_a, k_v, k_p = jax.random.split(key, 3)

    # Small shapes consistent with the module: hidden_size = 32, batch = 2,
    # seq = 4, 8 audio tokens and 8 vision tokens per (batch, seq) position.
    B, S, Na, Nv, D = 2, 4, 8, 8, 32
    audio = jax.random.normal(k_a, (B, S, Na, D), jnp.float32)
    vision = jax.random.normal(k_v, (B, S, Nv, D), jnp.float32)
    params = init_params(k_p, D)  # unused by forward(), initialized for fidelity

    # small_fallback_bytes=0 so the demo exercises the Pallas kernel itself.
    out = pairwise_cross_attention_forward(
        audio, vision, params, small_fallback_bytes=0
    )
    out = jax.block_until_ready(out)

    # Reference check against plain-JAX semantics of the torch forward.
    ref = jnp.concatenate(
        [audio.reshape(B * S, Na, D), vision.reshape(B * S, Nv, D)], axis=1
    ).reshape(B, S, Na + Nv, D)

    assert out.shape == (B, S, Na + Nv, D), out.shape
    assert jnp.array_equal(out, ref), "mismatch vs reference concatenation"

    print("KERNEL_OK")
</pallas_src>

<mosaic_0001>
module attributes {stable_mosaic.version = 11 : i64} {
  func.func @_concat_lanes_kernel(%arg0: i32, %arg1: memref<8x256xf32, #tpu.memory_space<vmem>>, %arg2: memref<8x256xf32, #tpu.memory_space<vmem>>, %arg3: memref<8x512xf32, #tpu.memory_space<vmem>>) attributes {dimension_semantics = [#tpu.dimension_semantics<parallel>], iteration_bounds = array<i64: 1>, scalar_prefetch = 0 : i64, scratch_operands = 0 : i64, tpu.core_type = #tpu.core_type<tc>, window_params = [{transform_indices = @transform_0, window_bounds = array<i64: 8, 256>}, {transform_indices = @transform_1, window_bounds = array<i64: 8, 256>}, {transform_indices = @transform_2, window_bounds = array<i64: 8, 512>}]} {
    %c0 = arith.constant 0 : index
    %c0_0 = arith.constant 0 : index
    %0 = vector.load %arg1[%c0, %c0_0] : memref<8x256xf32, #tpu.memory_space<vmem>>, vector<8x256xf32>
    %c0_1 = arith.constant 0 : index
    %c0_2 = arith.constant 0 : index
    %1 = vector.load %arg3[%c0_1, %c0_2] : memref<8x512xf32, #tpu.memory_space<vmem>>, vector<8x256xf32>
    tpu.vector_store %arg3[%c0_1, %c0_2], %0 {strides = array<i32>} : memref<8x512xf32, #tpu.memory_space<vmem>>, vector<8x256xf32>,
    %c0_3 = arith.constant 0 : index
    %c0_4 = arith.constant 0 : index
    %2 = vector.load %arg2[%c0_3, %c0_4] : memref<8x256xf32, #tpu.memory_space<vmem>>, vector<8x256xf32>
    %c0_5 = arith.constant 0 : index
    %c256 = arith.constant 256 : index
    %3 = vector.load %arg3[%c0_5, %c256] : memref<8x512xf32, #tpu.memory_space<vmem>>, vector<8x256xf32>
    tpu.vector_store %arg3[%c0_5, %c256], %2 {strides = array<i32>} : memref<8x512xf32, #tpu.memory_space<vmem>>, vector<8x256xf32>,
    return
  }
  func.func @transform_0(%arg0: i32) -> (i32, i32) {
    %c0_i32 = arith.constant 0 : i32
    %c0_i32_0 = arith.constant 0 : i32
    return %arg0, %c0_i32 : i32, i32
  }
  func.func @transform_1(%arg0: i32) -> (i32, i32) {
    %c0_i32 = arith.constant 0 : i32
    %c0_i32_0 = arith.constant 0 : i32
    return %arg0, %c0_i32 : i32, i32
  }
  func.func @transform_2(%arg0: i32) -> (i32, i32) {
    %c0_i32 = arith.constant 0 : i32
    %c0_i32_0 = arith.constant 0 : i32
    return %arg0, %c0_i32 : i32, i32
  }
}

</mosaic_0001>

<bundles_post_ra>
// kernel: tpu_custom_call.1
= control target key start
LH: loop header
LB: loop body
LE: loop exit
PB: predicated region body
PF: predicated region fallthrough
CT: control target
= control target key end

     0   :  { %7 = vsyncpa [#allocation3], 0  ;;  %s156_s0 = inlined_call_operand.hbm [shape: f32[8,256], index: 0, kind: input, shape index: {}]   ;;  %s157_s1 = inlined_call_operand.hbm [shape: f32[8,256], index: 1, kind: input, shape index: {}]   ;;  %s158_s2 = inlined_call_operand.hbm [shape: f32[8,512], index: 2, kind: output, shape index: {}]  }
   0x1   :  { %8 = vsyncpa [#allocation6], 0 }
   0x2   :  { %9 = vsyncpa [#allocation4], 0  ;;  %s129_s9 = smov [#allocation2]   ;;  %s130_s11 = smov [#allocation5]  }
   0x3   :  { %s16_s10 = sshll.u32 %s129_s9, 4  ;;  %s26_s12 = sshll.u32 %s130_s11, 4  ;;  %s17_s10 = int_to_ptr.vmem [resolvable:$true] %s16_s10  ;;  %s27_s12 = int_to_ptr.vmem [resolvable:$true] %s26_s12 }
   0x4   :  { %s71_s13 = scalar_lea.vmem %s17_s10, 256  ;;  %p76_p1 = scmp.lt.s32.totalorder %s17_s10, %s17_s10 }
   0x5   :  { %p72_p0 = scmp.ne.s32.totalorder %s17_s10, %s71_s13  ;;  %p77_p2 = scmp.lt.s32.totalorder %s71_s13, %s71_s13 }
   0x7   :  { %p78_p3 = por %p77_p2, %p76_p1 }
   0x9   :  { %p79_p4 = pnand %p78_p3, %p72_p0 }
   0xb   :  { %82 = shalt.err (!%p79_p4)
}
   0xc   :  { %19 = dma.hbm_to_vmem [thread:$0]  %s156_s0, 256, %s17_s10, [#allocation3]  }
   0xd   :  { %s91_s16 = scalar_lea.vmem %s27_s12, 256  ;;  %p96_p6 = scmp.lt.s32.totalorder %s27_s12, %s27_s12 }
   0xe   :  { %p92_p5 = scmp.ne.s32.totalorder %s27_s12, %s91_s16  ;;  %p97_p7 = scmp.lt.s32.totalorder %s91_s16, %s91_s16 }
  0x10   :  { %p98_p8 = por %p97_p7, %p96_p6 }
  0x12   :  { %p99_p9 = pnand %p98_p8, %p92_p5 }
  0x14   :  { %102 = shalt.err (!%p99_p9)
}
  0x15   :  { %29 = dma.hbm_to_vmem [thread:$0]  %s157_s1, 256, %s27_s12, [#allocation6]  }
  0x16   :  { %123 = dma.done.wait [#allocation3], 256  }
  0x17   :  { %124 = vsyncadd [#allocation3], 4294967040 }
  0x18   :  { %125 = dma.done.wait [#allocation6], 256  }
  0x19   :  { %126 = vsyncadd [#allocation6], 4294967040  ;;  %s131_s19 = smov [#allocation7]   ;;  %v36_v0 = vld [vmem:[#allocation2] sm:$0xff]  ;;  %v37_v1 = vld [vmem:[#allocation2 + $0x8] sm:$0xff] }
  0x1a   :  { %s50_s20 = sshll.u32 %s131_s19, 4  ;;  %v40_v2 = vld [vmem:[#allocation5] sm:$0xff]  ;;  %38 = vst [vmem:[#allocation7] sm:$0xff] %v36_v0  ;;  %39 = vst [vmem:[#allocation7 + $0x8] sm:$0xff] %v37_v1  ;;  %v41_v3 = vld [vmem:[#allocation5 + $0x8] sm:$0xff]  ;;  %s51_s20 = int_to_ptr.vmem [resolvable:$true] %s50_s20 }
  0x1b   :  { %42 = vst [vmem:[#allocation7 + $0x10] sm:$0xff] %v40_v2  ;;  %43 = vst [vmem:[#allocation7 + $0x18] sm:$0xff] %v41_v3  ;;  %s103_s0 = scalar_lea.vmem %s51_s20, 512  ;;  %p108_p11 = scmp.lt.s32.totalorder %s51_s20, %s51_s20 }
  0x1c   :  { %p104_p10 = scmp.ne.s32.totalorder %s51_s20, %s103_s0  ;;  %p109_p12 = scmp.lt.s32.totalorder %s103_s0, %s103_s0 }
  0x1e   :  { %p110_p13 = por %p109_p12, %p108_p11 }
  0x20   :  { %p111_p0 = pnand %p110_p13, %p104_p10 }
  0x22   :  { %114 = shalt.err (!%p111_p0)
}
  0x23   :  { %53 = dma.vmem_to_hbm [thread:$0]  %s51_s20, 512, %s158_s2, [#allocation4]  }
  0x24   :  { %127 = dma.done.wait [#allocation4], 512  }
  0x25   :  { %128 = vsyncadd [#allocation4], 4294966784 }
  0x26   :  { %57 = vsyncpa [#allocation3], 1 }
  0x27   :  { %58 = vsyncpa [#allocation6], 1 }
  0x28   :  { %59 = vsyncpa [#allocation4], 1 }

</bundles_post_ra>
